<compile_context>
chip_gen: v7x
topology: tpu7x:2x2x1
jax: 0.10.0
libtpu: 0.0.40
codegen_flags: <defaults>
</compile_context>

<pallas_src>
import functools

import jax
import jax.numpy as jnp
import numpy as np
from jax.experimental import pallas as pl
from jax.experimental.pallas import tpu as pltpu


def _round_up(n, m):
    return ((n + m - 1) // m) * m


def encoder_kernel(x_ref, w1_ref, b1_ref, whT_ref, bhT_ref, out_ref, *, z_dim):
    # fc1 + softplus: bf16 operands on the MXU, f32 accumulate / activation math.
    h = jnp.dot(x_ref[...], w1_ref[...],
                preferred_element_type=jnp.float32) + b1_ref[...]          # (TB, HP) f32
    # numerically stable softplus (matches torch): max(h,0) + log1p(exp(-|h|))
    h = jnp.maximum(h, 0.0) + jnp.log1p(jnp.exp(-jnp.abs(h)))

    # Fused heads, produced TRANSPOSED so the store is lane-dense:
    #   zT[n, b] = sum_k whT[n, k] * h[b, k]   (NT matmul, no explicit transpose op)
    zT = jax.lax.dot_general(
        whT_ref[...], h.astype(whT_ref.dtype),
        dimension_numbers=(((1,), (1,)), ((), ())),
        preferred_element_type=jnp.float32)                                # (ZW, TB)
    zT = zT + bhT_ref[...]                                                 # (ZW,1) lane-broadcast

    if z_dim % 8 == 0:
        # sublane-aligned static split: exp only on the scale half
        out_ref[:z_dim, :] = zT[:z_dim, :]
        out_ref[z_dim:, :] = jnp.exp(zT[z_dim:, :])
    else:
        row = jax.lax.broadcasted_iota(jnp.int32, zT.shape, 0)
        out_ref[...] = jnp.where(row < z_dim, zT, jnp.exp(zT))


def encoder_forward(x, params, *, tile_batch=2048):
    """x: any shape whose trailing dims flatten to 784 (e.g. (B, 1, 28, 28)).

    params: (w1 (784,H), b1 (H,), w21 (H,Z), b21 (Z,), w22 (H,Z), b22 (Z,)),
    weights stored transposed relative to torch.nn.Linear (in_features, out_features).
    Returns (z_loc (B,Z), z_scale (B,Z)) in float32.
    """
    w1, b1, w21, b21, w22, b22 = params
    in_dim = w1.shape[0]            # 784
    hidden = w1.shape[1]
    z_dim = w21.shape[1]
    ZW = 2 * z_dim                  # fused head width
    HP = _round_up(hidden, 128)     # lane-aligned hidden width (NOT padded further)

    x2 = x.reshape(-1, in_dim)
    B = x2.shape[0]
    x2 = x2.astype(jnp.bfloat16)                                   # halve HBM read stream

    # --- pack / pad parameters --------------------------------------------------------
    w1p = jnp.zeros((in_dim, HP), jnp.float32).at[:, :hidden].set(
        w1.astype(jnp.float32)).astype(jnp.bfloat16)
    b1p = jnp.zeros((1, HP), jnp.float32).at[:, :hidden].set(
        b1.reshape(1, -1).astype(jnp.float32))
    # fused + transposed head weights (ZW, HP); padded hidden cols are zero so the
    # (nonzero) softplus(0) values in padded hidden lanes contribute nothing.
    whT = jnp.zeros((ZW, HP), jnp.float32)
    whT = whT.at[:z_dim, :hidden].set(w21.T).at[z_dim:, :hidden].set(w22.T)
    whT = whT.astype(jnp.bfloat16)
    bhT = jnp.concatenate([b21, b22]).reshape(ZW, 1).astype(jnp.float32)

    # --- batch tiling -----------------------------------------------------------------
    # TB must be a multiple of 128 (it is the lane dim of the transposed output block);
    # cap it so the grid has >= 2 steps when B > 128 (v7x megacore utilization).
    tb_cap = max(128, _round_up(-(-B // 2), 128))
    TB = max(128, min(_round_up(tile_batch, 128), tb_cap))
    B_pad = _round_up(B, TB)
    if B_pad != B:
        x2 = jnp.pad(x2, ((0, B_pad - B), (0, 0)))

    grid = (B_pad // TB,)

    flops = 2 * B_pad * in_dim * HP + 2 * B_pad * HP * ZW
    transcendentals = 2 * B_pad * HP + B_pad * z_dim          # softplus exp+log1p, scale exp
    bytes_accessed = (B_pad * in_dim * 2 + in_dim * HP * 2 + HP * 4
                      + ZW * HP * 2 + ZW * 4 + ZW * B_pad * 4)

    # Explicit scoped-VMEM limit (v5e default is only 16 MiB); generous headroom.
    vmem_bytes = 2 * (TB * in_dim * 2 + in_dim * HP * 2 + HP * 4
                      + ZW * HP * 2 + ZW * 4 + ZW * TB * 4)   # double-buffered blocks
    vmem_bytes += 2 * TB * HP * 4 + 2 * ZW * TB * 4           # live f32 intermediates
    vmem_limit = int(min(max(32 << 20, 2 * vmem_bytes), 64 << 20))

    out = pl.pallas_call(
        functools.partial(encoder_kernel, z_dim=z_dim),
        out_shape=jax.ShapeDtypeStruct((ZW, B_pad), jnp.float32),
        grid=grid,
        in_specs=[
            pl.BlockSpec((TB, in_dim), lambda i: (i, 0)),     # streamed x tiles (bf16)
            pl.BlockSpec((in_dim, HP), lambda i: (0, 0)),     # resident fc1 weights (bf16)
            pl.BlockSpec((1, HP), lambda i: (0, 0)),          # fc1 bias (f32)
            pl.BlockSpec((ZW, HP), lambda i: (0, 0)),         # fused head weights^T (bf16)
            pl.BlockSpec((ZW, 1), lambda i: (0, 0)),          # fused head bias^T (f32)
        ],
        out_specs=pl.BlockSpec((ZW, TB), lambda i: (0, i)),   # lane-dense transposed output
        compiler_params=pltpu.CompilerParams(
            dimension_semantics=("parallel",),
            vmem_limit_bytes=vmem_limit),
        cost_estimate=pl.CostEstimate(
            flops=flops,
            transcendentals=transcendentals,
            bytes_accessed=bytes_accessed),
    )(x2, w1p, b1p, whT, bhT)

    z_loc = out[:z_dim, :B].T
    z_scale = out[z_dim:, :B].T
    return z_loc, z_scale


def init_params(key, z_dim, hidden_dim):
    """Deterministic synthetic parameters with nn.Linear-like init.

    Weights stored as (in, out); biases as 1-D (out,)."""
    k1, k2, k3, k4, k5, k6 = jax.random.split(key, 6)
    s1 = 1.0 / np.sqrt(784.0)
    s2 = 1.0 / np.sqrt(hidden_dim)
    w1 = jax.random.uniform(k1, (784, hidden_dim), jnp.float32, -s1, s1)
    b1 = jax.random.uniform(k2, (hidden_dim,), jnp.float32, -s1, s1)
    w21 = jax.random.uniform(k3, (hidden_dim, z_dim), jnp.float32, -s2, s2)
    b21 = jax.random.uniform(k4, (z_dim,), jnp.float32, -s2, s2)
    w22 = jax.random.uniform(k5, (hidden_dim, z_dim), jnp.float32, -s2, s2)
    b22 = jax.random.uniform(k6, (z_dim,), jnp.float32, -s2, s2)
    return (w1, b1, w21, b21, w22, b22)


def encoder_reference(x, params):
    w1, b1, w21, b21, w22, b22 = params
    x2 = x.reshape(-1, 784).astype(jnp.float32)
    h = jax.nn.softplus(x2 @ w1 + b1)
    return h @ w21 + b21, jnp.exp(h @ w22 + b22)


if __name__ == "__main__":
    key = jax.random.PRNGKey(0)
    k_x, k_p = jax.random.split(key)

    batch, z_dim, hidden_dim = 200, 8, 32
    # MNIST-like input, NCHW (B, 1, 28, 28); forward flattens to (B, 784).
    x = jax.random.normal(k_x, (batch, 1, 28, 28), dtype=jnp.float32)
    params = init_params(k_p, z_dim, hidden_dim)

    # tile_batch=128 + batch=200 exercises the 2-step grid and batch-pad path.
    z_loc, z_scale = encoder_forward(x, params, tile_batch=128)
    jax.block_until_ready((z_loc, z_scale))

    # sanity check against a pure-JAX f32 reference (tolerances relaxed for bf16 operands)
    ref_loc, ref_scale = encoder_reference(x, params)
    assert z_loc.shape == (batch, z_dim) and z_scale.shape == (batch, z_dim)
    assert np.allclose(np.asarray(z_loc), np.asarray(ref_loc), rtol=1e-2, atol=1e-2)
    assert np.allclose(np.asarray(z_scale), np.asarray(ref_scale), rtol=1e-2, atol=1e-2)
    assert np.all(np.asarray(z_scale) > 0.0)

    print("KERNEL_OK")
</pallas_src>

<mosaic_0001>
module attributes {stable_mosaic.version = 11 : i64} {
  func.func @encoder_kernel(%arg0: i32, %arg1: memref<128x784xbf16, #tpu.memory_space<vmem>>, %arg2: memref<784x128xbf16, #tpu.memory_space<vmem>>, %arg3: memref<1x128xf32, #tpu.memory_space<vmem>>, %arg4: memref<16x128xbf16, #tpu.memory_space<vmem>>, %arg5: memref<16x1xf32, #tpu.memory_space<vmem>>, %arg6: memref<16x128xf32, #tpu.memory_space<vmem>>) attributes {dimension_semantics = [#tpu.dimension_semantics<parallel>], iteration_bounds = array<i64: 2>, scalar_prefetch = 0 : i64, scratch_operands = 0 : i64, tpu.core_type = #tpu.core_type<tc>, window_params = [{transform_indices = @transform_0, window_bounds = array<i64: 128, 784>}, {pipeline_mode = #tpu.pipeline_mode<synchronous>, transform_indices = @transform_1, window_bounds = array<i64: 784, 128>}, {pipeline_mode = #tpu.pipeline_mode<synchronous>, transform_indices = @transform_2, window_bounds = array<i64: 1, 128>}, {pipeline_mode = #tpu.pipeline_mode<synchronous>, transform_indices = @transform_3, window_bounds = array<i64: 16, 128>}, {pipeline_mode = #tpu.pipeline_mode<synchronous>, transform_indices = @transform_4, window_bounds = array<i64: 16, 1>}, {transform_indices = @transform_5, window_bounds = array<i64: 16, 128>}]} {
    %c0 = arith.constant 0 : index
    %c0_0 = arith.constant 0 : index
    %0 = vector.load %arg1[%c0, %c0_0] : memref<128x784xbf16, #tpu.memory_space<vmem>>, vector<128x784xbf16>
    %c0_1 = arith.constant 0 : index
    %c0_2 = arith.constant 0 : index
    %1 = vector.load %arg2[%c0_1, %c0_2] : memref<784x128xbf16, #tpu.memory_space<vmem>>, vector<784x128xbf16>
    %cst = arith.constant dense<0.000000e+00> : vector<128x128xf32>
    %2 = tpu.matmul %0, %1, %cst {dimension_numbers = #tpu.dot_dimension_numbers<[1], [0], [0], [1], [0, 0, 1, 1], [], []>} : vector<128x784xbf16>, vector<784x128xbf16>, vector<128x128xf32> -> vector<128x128xf32>
    %c0_3 = arith.constant 0 : index
    %c0_4 = arith.constant 0 : index
    %3 = vector.load %arg3[%c0_3, %c0_4] : memref<1x128xf32, #tpu.memory_space<vmem>>, vector<1x128xf32>
    %4 = vector.broadcast %3 : vector<1x128xf32> to vector<128x128xf32>
    %5 = arith.addf %2, %4 : vector<128x128xf32>
    %cst_5 = arith.constant 0.000000e+00 : f32
    %6 = vector.broadcast %cst_5 : f32 to vector<128x128xf32>
    %7 = arith.maximumf %5, %6 : vector<128x128xf32>
    %8 = math.absf %5 : vector<128x128xf32>
    %cst_6 = arith.constant 0.000000e+00 : f32
    %9 = vector.broadcast %cst_6 : f32 to vector<128x128xf32>
    %10 = arith.subf %9, %8 : vector<128x128xf32>
    %11 = math.exp %10 : vector<128x128xf32>
    %12 = math.log1p %11 : vector<128x128xf32>
    %13 = arith.addf %7, %12 : vector<128x128xf32>
    %c0_7 = arith.constant 0 : index
    %c0_8 = arith.constant 0 : index
    %14 = vector.load %arg4[%c0_7, %c0_8] : memref<16x128xbf16, #tpu.memory_space<vmem>>, vector<16x128xbf16>
    %15 = arith.truncf %13 : vector<128x128xf32> to vector<128x128xbf16>
    %cst_9 = arith.constant dense<0.000000e+00> : vector<16x128xf32>
    %16 = tpu.matmul %14, %15, %cst_9 {dimension_numbers = #tpu.dot_dimension_numbers<[1], [1], [0], [0], [0, 0, 1, 0], [], []>} : vector<16x128xbf16>, vector<128x128xbf16>, vector<16x128xf32> -> vector<16x128xf32>
    %c0_10 = arith.constant 0 : index
    %c0_11 = arith.constant 0 : index
    %17 = vector.load %arg5[%c0_10, %c0_11] : memref<16x1xf32, #tpu.memory_space<vmem>>, vector<16x1xf32>
    %18 = vector.broadcast %17 : vector<16x1xf32> to vector<16x128xf32>
    %19 = arith.addf %16, %18 : vector<16x128xf32>
    %20 = vector.extract_strided_slice %19 {offsets = [0, 0], sizes = [8, 128], strides = [1, 1]} : vector<16x128xf32> to vector<8x128xf32>
    %c0_12 = arith.constant 0 : index
    %c0_13 = arith.constant 0 : index
    %21 = vector.load %arg6[%c0_12, %c0_13] : memref<16x128xf32, #tpu.memory_space<vmem>>, vector<8x128xf32>
    tpu.vector_store %arg6[%c0_12, %c0_13], %20 {strides = array<i32>} : memref<16x128xf32, #tpu.memory_space<vmem>>, vector<8x128xf32>,
    %22 = vector.extract_strided_slice %19 {offsets = [8, 0], sizes = [8, 128], strides = [1, 1]} : vector<16x128xf32> to vector<8x128xf32>
    %23 = math.exp %22 : vector<8x128xf32>
    %c8 = arith.constant 8 : index
    %c0_14 = arith.constant 0 : index
    %24 = vector.load %arg6[%c8, %c0_14] : memref<16x128xf32, #tpu.memory_space<vmem>>, vector<8x128xf32>
    tpu.vector_store %arg6[%c8, %c0_14], %23 {strides = array<i32>} : memref<16x128xf32, #tpu.memory_space<vmem>>, vector<8x128xf32>,
    return
  }
  func.func @transform_0(%arg0: i32) -> (i32, i32) {
    %c0_i32 = arith.constant 0 : i32
    %c0_i32_0 = arith.constant 0 : i32
    return %arg0, %c0_i32 : i32, i32
  }
  func.func @transform_1(%arg0: i32) -> (i32, i32) {
    %c0_i32 = arith.constant 0 : i32
    %c0_i32_0 = arith.constant 0 : i32
    %c0_i32_1 = arith.constant 0 : i32
    return %c0_i32, %c0_i32_0 : i32, i32
  }
  func.func @transform_2(%arg0: i32) -> (i32, i32) {
    %c0_i32 = arith.constant 0 : i32
    %c0_i32_0 = arith.constant 0 : i32
    %c0_i32_1 = arith.constant 0 : i32
    return %c0_i32, %c0_i32_0 : i32, i32
  }
  func.func @transform_3(%arg0: i32) -> (i32, i32) {
    %c0_i32 = arith.constant 0 : i32
    %c0_i32_0 = arith.constant 0 : i32
    %c0_i32_1 = arith.constant 0 : i32
    return %c0_i32, %c0_i32_0 : i32, i32
  }
  func.func @transform_4(%arg0: i32) -> (i32, i32) {
    %c0_i32 = arith.constant 0 : i32
    %c0_i32_0 = arith.constant 0 : i32
    %c0_i32_1 = arith.constant 0 : i32
    return %c0_i32, %c0_i32_0 : i32, i32
  }
  func.func @transform_5(%arg0: i32) -> (i32, i32) {
    %c0_i32 = arith.constant 0 : i32
    %c0_i32_0 = arith.constant 0 : i32
    return %c0_i32, %arg0 : i32, i32
  }
}

</mosaic_0001>

<bundles_post_ra>
// kernel: tpu_custom_call.1
= control target key start
LH: loop header
LB: loop body
LE: loop exit
PB: predicated region body
PF: predicated region fallthrough
CT: control target
= control target key end

     0   :  { %10 = vsyncpa [#allocation3], 0  ;;  %s3175_s0 = inlined_call_operand.vmem [shape: bf16[256,784], index: 0, kind: input, shape index: {}]   ;;  %s3176_s1 = inlined_call_operand.vmem [shape: bf16[784,128], index: 1, kind: input, shape index: {}]   ;;  %s3177_s2 = inlined_call_operand.vmem [shape: f32[1,128], index: 2, kind: input, shape index: {}]   ;;  %s3178_s3 = inlined_call_operand.vmem [shape: bf16[16,128], index: 3, kind: input, shape index: {}]   ;;  %s3179_s4 = inlined_call_operand.vmem [shape: f32[16,1], index: 4, kind: input, shape index: {}]   ;;  %s3180_s5 = inlined_call_operand.hbm [shape: f32[16,256], index: 5, kind: output, shape index: {}]  }
   0x1   :  { %12 = vsyncpa [#allocation3 + $0x1], 0  ;;  %s2507_s18 = smov 0   ;;  %s2509_s19 = smov 0  }
   0x2   :  { %s2511_s20 = smov 0   ;;  %s2513_s21 = smov 0  }
   0x3 LB: > { %s2528_s22 = sadd.s32 4294967295, %s2468_s21   ;;  %s1773_s23 = sadd.s32 4294967294, %s2468_s21   ;;  %s2468_s21 = sphi %s2513_s21, %s3208_s21   ;;  %s2464_s20 = sphi %s2511_s20, %s3207_s20   ;;  %s2460_s19 = sphi %s2509_s19, %s3206_s19   ;;  %s2456_s18 = sphi %s2507_s18, %s3205_s18  }
   0x4   : > { %s2532_s24 = sadd.s32 1, %s2468_s21   ;;  %s135_s25 = sadd.s32 1, %s2464_s20 }
   0x5   : > { %s132_s26 = ssub.s32 %s2468_s21, %s2532_s24  ;;  %p145_p0 = scmp.ne.s32.totalorder %s2464_s20, %s2460_s19 }
   0x6   : > { %p133_p1 = scmp.eq.s32.totalorder %s132_s26, 0  ;;  %p146_p2 = scmp.eq.s32.totalorder %s2528_s22, 1 }
   0x7   : > { %p151_p3 = scmp.ne.s32.totalorder %s2460_s19, %s2456_s18  ;;  %p152_p4 = scmp.eq.s32.totalorder %s1773_s23, 1 }
   0x8   : > { %s2543_s27 = scalar_select %p133_p1, %s2464_s20, %s135_s25  }
   0x9   : > { %p2545_p5 = por %p146_p2, %p145_p0  ;;  %p2549_p6 = por %p152_p4, %p151_p3 }
   0xa   : > { %p1776_p7 = scmp.ge.s32.totalorder %s2468_s21, 1  ;;  %p192_p8 = scmp.lt.s32.totalorder %s2468_s21, 3 }
   0xc   : > { %p193_p9 = pnand %p1776_p7, %p192_p8 }
   0xd   : > { %v2210_v0 = vld [vmem:[%s3176_s1 + $0x40] sm:$0xff] (!%p193_p9)   ;;  %s1778_s7 = sshll.u32 (!%p193_p9), %s2528_s22, 4  ;;  %v2212_v2 = vld [vmem:[%s3176_s1 + $0x48] sm:$0xff] (!%p193_p9)   ;;  %v2214_v4 = vld [vmem:[%s3176_s1 + $0x50] sm:$0xff] (!%p193_p9)   ;;  %vm972_vm0 = vcmask (!%p193_p9), 130048   ;;  %vm2471_vm1 = vmmov (!%p193_p9), 0  }
   0xe   : > { %196 = sbr.rel (%p193_p9) target bundleno = 708 (0x2c4), region = 40  ;;  %v2211_v1 = vld [vmem:[%s3176_s1] sm:$0xff] (!%p193_p9)   ;;  %2147 = vmatprep.subr.bf16.mxu1 (!%p193_p9), %v2210_v0  ;;  %1899 = vmatprep.subr.bf16.mxu0 (!%p193_p9), %v2210_v0  ;;  %p222_p10 = scmp.lt.s32.totalorder (!%p193_p9), %s1778_s7, 31  ;;  %v2213_v3 = vld [vmem:[%s3176_s1 + $0x8] sm:$0xff] (!%p193_p9)   ;;  %v2215_v5 = vld [vmem:[%s3176_s1 + $0x10] sm:$0xff] (!%p193_p9)  }
   0xf   : > { %2155 = vmatpush3.bf16.msra.mxu1 (!%p193_p9), %v2211_v1  ;;  %1900 = vmatpush3.bf16.msra.mxu0 (!%p193_p9), %v2211_v1  ;;  %v2216_v6 = vld [vmem:[%s3176_s1 + $0x58] sm:$0xff] (!%p193_p9)   ;;  %v2218_v8 = vld [vmem:[%s3176_s1 + $0x60] sm:$0xff] (!%p193_p9)   ;;  %v2220_v10 = vld [vmem:[%s3176_s1 + $0x68] sm:$0xff] (!%p193_p9)   ;;  %s218_s9 = sand.u32 (!%p193_p9), 1, %s2460_s19   ;;  %s1896_s13 = sshll.u32 (!%p193_p9), %s2528_s22, 7 }
  0x10   : > { %2148 = vmatprep.subr.bf16.mxu1 (!%p193_p9), %v2212_v2  ;;  %1901 = vmatprep.subr.bf16.mxu0 (!%p193_p9), %v2212_v2  ;;  %v2217_v7 = vld [vmem:[%s3176_s1 + $0x18] sm:$0xff] (!%p193_p9)   ;;  %v2219_v9 = vld [vmem:[%s3176_s1 + $0x20] sm:$0xff] (!%p193_p9)   ;;  %v2221_v12 = vld [vmem:[%s3176_s1 + $0x28] sm:$0xff] (!%p193_p9)   ;;  %s1777_s10 = sshll.u32 (!%p193_p9), %s218_s9, 4  ;;  %s3132_s16 = scalar_lea.hbm (!%p193_p9), %s3180_s5, %s1896_s13 }
  0x11   : > { %v2222_v14 = vld [vmem:[%s3176_s1 + $0x70] sm:$0xff] (!%p193_p9)   ;;  %v2224_v16 = vld [vmem:[%s3176_s1 + $0x78] sm:$0xff] (!%p193_p9)   ;;  %v2229_v18 = vld [vmem:[%s3176_s1 + $0xc0] sm:$0xff] (!%p193_p9)   ;;  %s220_s11 = scalar_lea.vmem (!%p193_p9), [#allocation2], %s1777_s10  ;;  %s2473_s22 = smov (!%p193_p9), [#allocation2]  }
  0x12   : > { %v2223_v15 = vld [vmem:[%s3176_s1 + $0x30] sm:$0xff] (!%p193_p9)   ;;  %v2225_v17 = vld [vmem:[%s3176_s1 + $0x38] sm:$0xff] (!%p193_p9)   ;;  %v2234_v21 = vld [vmem:[%s3176_s1 + $0x140] sm:$0xff] (!%p193_p9)   ;;  %s2410_s23 = sshll.u32 (!%p193_p9), %s2473_s22, 4  ;;  %s2411_s23 = int_to_ptr.vmem [resolvable:$false] %s2410_s23 }
  0x13   : > { %2156 = vmatpush3.bf16.msra.mxu1 (!%p193_p9), %v2213_v3  ;;  %1902 = vmatpush3.bf16.msra.mxu0 (!%p193_p9), %v2213_v3  ;;  %v2233_v22 = vld [vmem:[%s3176_s1 + $0x80] sm:$0xff] (!%p193_p9)   ;;  %v2236_v24 = vld [vmem:[%s3176_s1 + $0xc8] sm:$0xff] (!%p193_p9)   ;;  %v2243_v30 = vld [vmem:[%s3176_s1 + $0xd0] sm:$0xff] (!%p193_p9)   ;;  %s2412_s25 = scalar_lea.vmem (!%p193_p9), %s2411_s23, 512 }
  0x14   : > { %2149 = vmatprep.subr.bf16.mxu1 (!%p193_p9), %v2214_v4  ;;  %1903 = vmatprep.subr.bf16.mxu0 (!%p193_p9), %v2214_v4  ;;  %v2235_v23 = vld [vmem:[%s3176_s1 + $0x100] sm:$0xff] (!%p193_p9)   ;;  %v2238_v25 = vld [vmem:[%s3176_s1 + $0x148] sm:$0xff] (!%p193_p9)   ;;  %v2248_v32 = vld [vmem:[%s3176_s1 + $0x150] sm:$0xff] (!%p193_p9)  }
  0x15   : > { %s3210_s7 = smov (!%p222_p10, %s1778_s7), 31  ;;  %v2237_v27 = vld [vmem:[%s3176_s1 + $0x88] sm:$0xff]   ;;  %v2246_v33 = vld [vmem:[%s3176_s1 + $0x90] sm:$0xff]   ;;  %v2250_v36 = vld [vmem:[%s3176_s1 + $0xd8] sm:$0xff]  }
  0x16   : > { %s2163_s26 = smul.u32 28, %s3210_s7  ;;  %v2241_v29 = vld [vmem:[%s3176_s1 + $0x108] sm:$0xff]   ;;  %v2249_v35 = vld [vmem:[%s3176_s1 + $0x110] sm:$0xff]   ;;  %v2252_v37 = vld [vmem:[%s3176_s1 + $0x158] sm:$0xff]   ;;  %s1711_s7 = sshll.u32 %s220_s11, 4  ;;  %s3127_s7 = int_to_ptr.vmem [resolvable:$true] %s1711_s7 }
  0x17   : > { %2157 = vmatpush3.bf16.msra.mxu1 %v2215_v5  ;;  %1904 = vmatpush3.bf16.msra.mxu0 %v2215_v5  ;;  %v2251_v38 = vld [vmem:[%s3176_s1 + $0x98] sm:$0xff]   ;;  %v2257_v42 = vld [vmem:[%s3176_s1 + $0xe0] sm:$0xff]   ;;  %v2264_v48 = vld [vmem:[%s3176_s1 + $0xe8] sm:$0xff]   ;;  %s2406_s17 = scalar_lea.vmem %s3127_s7, 256  ;;  %p2413_p0 = scmp.lt.s32.totalorder %s3127_s7, %s2411_s23 }
  0x18   : > { %2150 = vmatprep.subr.bf16.mxu1 %v2216_v6  ;;  %1905 = vmatprep.subr.bf16.mxu0 %v2216_v6  ;;  %s2586_s12 = scalar_lea.vmem %s3175_s0, %s2163_s26  ;;  %v2255_v41 = vld [vmem:[%s3176_s1 + $0x118] sm:$0xff]   ;;  %v2262_v44 = vld [vmem:[%s3176_s1 + $0x160] sm:$0xff]   ;;  %v2266_v49 = vld [vmem:[%s3176_s1 + $0x168] sm:$0xff]   ;;  %p2407_p11 = scmp.ne.s32.totalorder %s3127_s7, %s2406_s17 }
  0x19   : > { %v2228_v11 = vld [vmem:[%s2586_s12 + $0xe4] ss:$28 sps:$4 sm:$0xff]   ;;  %v2239_v26 = vld [vmem:[%s2586_s12 + $0x11c] ss:$28 sps:$4 sm:$0xff]   ;;  %v2253_v39 = vld [vmem:[%s2586_s12 + $0x154] ss:$28 sps:$4 sm:$0xff]   ;;  %p2414_p1 = scmp.lt.s32.totalorder %s2412_s25, %s2406_s17 }
  0x1a   : > { %v2232_v13 = vld [vmem:[%s2586_s12 + $0x4] ss:$28 sps:$4 sm:$0xff]   ;;  %1061 = vmatprep.mubr.bf16.mxu1 %v2228_v11  ;;  %v2244_v28 = vld [vmem:[%s2586_s12 + $0x3c] ss:$28 sps:$4 sm:$0xff]   ;;  %v2258_v40 = vld [vmem:[%s2586_s12 + $0x74] ss:$28 sps:$4 sm:$0xff]   ;;  %p2408_p12 = pnand %p2407_p11, %p2545_p5 }
  0x1b   : > { %2158 = vmatpush3.bf16.msra.mxu1 %v2217_v7  ;;  %1906 = vmatpush3.bf16.msra.mxu0 %v2217_v7  ;;  %v2226_v19 = vld [vmem:[%s2586_s12 + $0xe0] ss:$28 sps:$4 sm:$0xff]   ;;  %v2242_v31 = vld [vmem:[%s2586_s12 + $0x118] ss:$28 sps:$4 sm:$0xff]   ;;  %v2256_v43 = vld [vmem:[%s2586_s12 + $0x150] ss:$28 sps:$4 sm:$0xff]   ;;  %p2415_p2 = por %p2414_p1, %p2413_p0 }
  0x1c   : > { %2151 = vmatprep.subr.bf16.mxu1 %v2218_v8  ;;  %1907 = vmatprep.subr.bf16.mxu0 %v2218_v8  ;;  %v2230_v20 = vld [vmem:[%s2586_s12] ss:$28 sps:$4 sm:$0xff]   ;;  %v2247_v34 = vld [vmem:[%s2586_s12 + $0x38] ss:$28 sps:$4 sm:$0xff]   ;;  %v2261_v46 = vld [vmem:[%s2586_s12 + $0x70] ss:$28 sps:$4 sm:$0xff]   ;;  %p2409_p13 = pneg %p2408_p12 }
  0x1d   : > { %1029 = vmatprep.mubr.bf16.mxu0 %v2232_v13  ;;  %v2260_v45 = vld [vmem:[%s3176_s1 + $0xa0] sm:$0xff]   ;;  %v2265_v50 = vld [vmem:[%s3176_s1 + $0xa8] sm:$0xff]   ;;  %v2271_v55 = vld [vmem:[%s3176_s1 + $0xf0] sm:$0xff]  }
  0x1e   : > { %v2263_v47 = vld [vmem:[%s3176_s1 + $0x120] sm:$0xff]   ;;  %v2267_v51 = vld [vmem:[%s2586_s12 + $0x18c] ss:$28 sps:$4 sm:$0xff]   ;;  %v2274_v56 = vld [vmem:[%s3176_s1 + $0xb0] sm:$0xff]   ;;  %p2416_p3 = pnand %p2415_p2, %p2409_p13 }
  0x1f   : > { %2159 = vmatpush3.bf16.msra.mxu1 %v2219_v9  ;;  %1908 = vmatpush3.bf16.msra.mxu0 %v2219_v9  ;;  %v2269_v52 = vld [vmem:[%s3176_s1 + $0x128] sm:$0xff]   ;;  %v2276_v57 = vld [vmem:[%s3176_s1 + $0x170] sm:$0xff]   ;;  %v2278_v60 = vld [vmem:[%s3176_s1 + $0xf8] sm:$0xff]  }
  0x20   : > { %2152 = vmatprep.subr.bf16.mxu1 %v2220_v10  ;;  %1909 = vmatprep.subr.bf16.mxu0 %v2220_v10  ;;  %v2272_v53 = vld [vmem:[%s2586_s12 + $0xac] ss:$28 sps:$4 sm:$0xff]   ;;  %v2277_v59 = vld [vmem:[%s3176_s1 + $0x130] sm:$0xff]   ;;  %v2280_v61 = vld [vmem:[%s3176_s1 + $0x178] sm:$0xff]  }
  0x21   : > { %v2270_v54 = vld [vmem:[%s2586_s12 + $0x188] ss:$28 sps:$4 sm:$0xff]   ;;  %v2279_v62 = vld [vmem:[%s3176_s1 + $0xb8] sm:$0xff]   ;;  %v2286_v3 = vld [vmem:[%s2586_s12 + $0x10] ss:$28 sps:$4 sm:$0xff]  }
  0x22   : > { %v2275_v58 = vld [vmem:[%s2586_s12 + $0xa8] ss:$28 sps:$4 sm:$0xff]   ;;  %v2284_v0 = vld [vmem:[%s3176_s1 + $0x138] sm:$0xff]   ;;  %v2288_v4 = vld [vmem:[%s2586_s12 + $0x14] ss:$28 sps:$4 sm:$0xff]  }
  0x23   : > { %2160 = vmatpush3.bf16.msra.mxu1 %v2221_v12  ;;  %1910 = vmatpush3.bf16.msra.mxu0 %v2221_v12  ;;  %v2283_v63 = vld [vmem:[%s2586_s12 + $0xc] ss:$28 sps:$4 sm:$0xff]   ;;  %v2285_v2 = vld [vmem:[%s3176_s1 + $0x180] sm:$0xff]   ;;  %v2295_v9 = vld [vmem:[%s2586_s12 + $0x7c] ss:$28 sps:$4 sm:$0xff]  }
  0x24   : > { %2153 = vmatprep.subr.bf16.mxu1 %v2222_v14  ;;  %1911 = vmatprep.subr.bf16.mxu0 %v2222_v14  ;;  %v2281_v1 = vld [vmem:[%s2586_s12 + $0x8] ss:$28 sps:$4 sm:$0xff]   ;;  %v2291_v7 = vld [vmem:[%s2586_s12 + $0x40] ss:$28 sps:$4 sm:$0xff]   ;;  %v2297_v11 = vld [vmem:[%s2586_s12 + $0x78] ss:$28 sps:$4 sm:$0xff]  }
  0x25   : > { %v2289_v5 = vld [vmem:[%s2586_s12 + $0x44] ss:$28 sps:$4 sm:$0xff]   ;;  %v2292_v6 = vld [vmem:[%s2586_s12 + $0x4c] ss:$28 sps:$4 sm:$0xff]   ;;  %v2301_v13 = vld [vmem:[%s2586_s12 + $0xb4] ss:$28 sps:$4 sm:$0xff]  }
  0x26   : > { %v2294_v8 = vld [vmem:[%s2586_s12 + $0x48] ss:$28 sps:$4 sm:$0xff]   ;;  %v2300_v12 = vld [vmem:[%s2586_s12 + $0x80] ss:$28 sps:$4 sm:$0xff]  }
  0x27   : > { %2161 = vmatpush3.bf16.msra.mxu1 %v2223_v15  ;;  %1912 = vmatpush3.bf16.msra.mxu0 %v2223_v15  ;;  %v2298_v10 = vld [vmem:[%s2586_s12 + $0x84] ss:$28 sps:$4 sm:$0xff]   ;;  %v2304_v14 = vld [vmem:[%s2586_s12 + $0xbc] ss:$28 sps:$4 sm:$0xff]   ;;  %v2303_v15 = vld [vmem:[%s2586_s12 + $0xb0] ss:$28 sps:$4 sm:$0xff]  }
  0x28   : > { %2154 = vmatprep.subr.bf16.mxu1 %v2224_v16  ;;  %1913 = vmatprep.subr.bf16.mxu0 %v2224_v16  ;;  %v2306_v16 = vld [vmem:[%s2586_s12 + $0xb8] ss:$28 sps:$4 sm:$0xff]  }
  0x2b   : > { %2162 = vmatpush3.bf16.msra.mxu1 %v2225_v17  ;;  %1914 = vmatpush3.bf16.msra.mxu0 %v2225_v17  ;;  %v2307_v17 = vld [vmem:[%s2586_s12 + $0xec] ss:$28 sps:$4 sm:$0xff]  }
  0x2c   : > { %1963 = vmatprep.subr.bf16.mxu1 %v2229_v18  ;;  %2027 = vmatprep.subr.bf16.mxu0 %v2234_v21  ;;  %v2310_v18 = vld [vmem:[%s2586_s12 + $0xf4] ss:$28 sps:$4 sm:$0xff]   ;;  %v2313_v21 = vld [vmem:[%s2586_s12 + $0x124] ss:$28 sps:$4 sm:$0xff]  }
  0x2e   : > { %1062 = vmatmul.mubr.bf16.vlgmr.msra.gmra.mrb[0].mxu1 %v2226_v19  ;;  %1030 = vmatmul.mubr.bf16.vlgmr.msra.gmra.mrb[0].mxu0 %v2230_v20  ;;  %v2309_v19 = vld [vmem:[%s2586_s12 + $0xe8] ss:$28 sps:$4 sm:$0xff]   ;;  %v2312_v20 = vld [vmem:[%s2586_s12 + $0xf0] ss:$28 sps:$4 sm:$0xff]  }
  0x2f   : > { %1964 = vmatpush3.bf16.msra.mxu1 %v2233_v22  ;;  %2028 = vmatpush3.bf16.msra.mxu0 %v2235_v23  ;;  %v2316_v22 = vld [vmem:[%s2586_s12 + $0x12c] ss:$28 sps:$4 sm:$0xff]   ;;  %v2315_v23 = vld [vmem:[%s2586_s12 + $0x120] ss:$28 sps:$4 sm:$0xff]  }
  0x30   : > { %1965 = vmatprep.subr.bf16.mxu1 %v2236_v24  ;;  %2029 = vmatprep.subr.bf16.mxu0 %v2238_v25  ;;  %v2318_v24 = vld [vmem:[%s2586_s12 + $0x128] ss:$28 sps:$4 sm:$0xff]   ;;  %v2319_v25 = vld [vmem:[%s2586_s12 + $0x15c] ss:$28 sps:$4 sm:$0xff]  }
  0x31   : > { %1069 = vmatprep.mubr.bf16.mxu1 %v2239_v26  ;;  %1037 = vmatprep.mubr.bf16.mxu0 %v2244_v28  ;;  %v2322_v26 = vld [vmem:[%s2586_s12 + $0x164] ss:$28 sps:$4 sm:$0xff]  }
  0x32   : > { %v2324_v28 = vld [vmem:[%s2586_s12 + $0x160] ss:$28 sps:$4 sm:$0xff]  }
  0x33   : > { %1966 = vmatpush3.bf16.msra.mxu1 %v2237_v27  ;;  %2030 = vmatpush3.bf16.msra.mxu0 %v2241_v29  ;;  %v2321_v27 = vld [vmem:[%s2586_s12 + $0x158] ss:$28 sps:$4 sm:$0xff]  }
  0x34   : > { %1967 = vmatprep.subr.bf16.mxu1 %v2243_v30  ;;  %2031 = vmatprep.subr.bf16.mxu0 %v2248_v32  ;;  %v2325_v29 = vld [vmem:[%s2586_s12 + $0x194] ss:$28 sps:$4 sm:$0xff]   ;;  %v2328_v30 = vld [vmem:[%s2586_s12 + $0x19c] ss:$28 sps:$4 sm:$0xff]  }
  0x35   : > { %v2330_v32 = vld [vmem:[%s2586_s12 + $0x198] ss:$28 sps:$4 sm:$0xff]  }
  0x36   : > { %1070 = vmatmul.mubr.bf16.gmra.mrb[4].mxu1 %v2242_v31  ;;  %1038 = vmatmul.mubr.bf16.gmra.mrb[4].mxu0 %v2247_v34  ;;  %v2327_v31 = vld [vmem:[%s2586_s12 + $0x190] ss:$28 sps:$4 sm:$0xff]  }
  0x37   : > { %1968 = vmatpush3.bf16.msra.mxu1 %v2246_v33  ;;  %2032 = vmatpush3.bf16.msra.mxu0 %v2249_v35  ;;  %v2331_v33 = vld [vmem:[%s2586_s12 + $0x18] ss:$28 sps:$4 sm:$0xff]   ;;  %v2332_v34 = vld [vmem:[%s2586_s12 + $0x50] ss:$28 sps:$4 sm:$0xff]   ;;  %v2333_v35 = vld [vmem:[%s2586_s12 + $0x88] ss:$28 sps:$4 sm:$0xff]  }
  0x38   : > { %1969 = vmatprep.subr.bf16.mxu1 %v2250_v36  ;;  %2033 = vmatprep.subr.bf16.mxu0 %v2252_v37  ;;  %v2334_v36 = vld [vmem:[%s2586_s12 + $0xc0] ss:$28 sps:$4 sm:$0xff]   ;;  %v2335_v37 = vld [vmem:[%s2586_s12 + $0xf8] ss:$28 sps:$4 sm:$0xff]  }
  0x39   : > { %1077 = vmatprep.mubr.bf16.mxu1 %v2253_v39  ;;  %1045 = vmatprep.mubr.bf16.mxu0 %v2258_v40  ;;  %v2337_v39 = vld [vmem:[%s2586_s12 + $0x168] ss:$28 sps:$4 sm:$0xff]   ;;  %v2338_v40 = vld [vmem:[%s2586_s12 + $0x1a0] ss:$28 sps:$4 sm:$0xff]  }
  0x3b   : > { %1970 = vmatpush3.bf16.msra.mxu1 %v2251_v38  ;;  %2034 = vmatpush3.bf16.msra.mxu0 %v2255_v41  ;;  %v2336_v38 = vld [vmem:[%s2586_s12 + $0x130] ss:$28 sps:$4 sm:$0xff]   ;;  %s3134_s12 = scalar_lea.sflag [#allocation3], %s218_s9 }
  0x3c   : > { %1971 = vmatprep.subr.bf16.mxu1 %v2257_v42  ;;  %2035 = vmatprep.subr.bf16.mxu0 %v2262_v44 }
  0x3e   : > { %1078 = vmatmul.mubr.bf16.gmra.mrb[8].mxu1 %v2256_v43  ;;  %1046 = vmatmul.mubr.bf16.gmra.mrb[8].mxu0 %v2261_v46 }
  0x3f   : > { %1972 = vmatpush3.bf16.msra.mxu1 %v2260_v45  ;;  %2036 = vmatpush3.bf16.msra.mxu0 %v2263_v47 }
  0x40   : > { %1973 = vmatprep.subr.bf16.mxu1 %v2264_v48  ;;  %2037 = vmatprep.subr.bf16.mxu0 %v2266_v49 }
  0x41   : > { %1085 = vmatprep.mubr.bf16.mxu1 %v2267_v51  ;;  %1053 = vmatprep.mubr.bf16.mxu0 %v2272_v53 }
  0x43   : > { %1974 = vmatpush3.bf16.msra.mxu1 %v2265_v50  ;;  %2038 = vmatpush3.bf16.msra.mxu0 %v2269_v52 }
  0x44   : > { %1975 = vmatprep.subr.bf16.mxu1 %v2271_v55  ;;  %2039 = vmatprep.subr.bf16.mxu0 %v2276_v57 }
  0x46   : > { %1086 = vmatmul.mubr.bf16.gmra.mrb[12].mxu1 %v2270_v54  ;;  %1054 = vmatmul.mubr.bf16.gmra.mrb[12].mxu0 %v2275_v58 }
  0x47   : > { %1976 = vmatpush3.bf16.msra.mxu1 %v2274_v56  ;;  %2040 = vmatpush3.bf16.msra.mxu0 %v2277_v59 }
  0x48   : > { %1977 = vmatprep.subr.bf16.mxu1 %v2278_v60  ;;  %2041 = vmatprep.subr.bf16.mxu0 %v2280_v61 }
  0x49   : > { %1126 = vmatprep.mubr.bf16.mxu1 %v2283_v63  ;;  %1223 = vmatprep.mubr.bf16.mxu0 %v2288_v4 }
  0x4b   : > { %1978 = vmatpush3.bf16.msra.mxu1 %v2279_v62  ;;  %2042 = vmatpush3.bf16.msra.mxu0 %v2284_v0 }
  0x4c   : > { %2109 = vmatprep.subr.bf16.mxu1 %v2285_v2 }
  0x4e   : > { %1127 = vmatmul.mubr.bf16.vlgmr.msra.gmra.mrb[16].mxu1 %v2281_v1  ;;  %1224 = vmatmul.mubr.bf16.vlgmr.msra.gmra.mrb[16].mxu0 %v2286_v3 }
  0x4f   : > { %2110 = vmatpush3.bf16.msra.mxu1 %v2285_v2  ;;  %1134 = vmatprep.mubr.bf16.mxu1 %v2289_v5 }
  0x50   : > { %1231 = vmatprep.mubr.bf16.mxu0 %v2292_v6 }
  0x56   : > { %1135 = vmatmul.mubr.bf16.gmra.mrb[20].mxu1 %v2291_v7  ;;  %1232 = vmatmul.mubr.bf16.gmra.mrb[20].mxu0 %v2294_v8 }
  0x57   : > { %1142 = vmatprep.mubr.bf16.mxu1 %v2295_v9  ;;  %1239 = vmatprep.mubr.bf16.mxu0 %v2298_v10 }
  0x5e   : > { %1143 = vmatmul.mubr.bf16.gmra.mrb[24].mxu1 %v2297_v11  ;;  %1240 = vmatmul.mubr.bf16.gmra.mrb[24].mxu0 %v2300_v12 }
  0x5f   : > { %1150 = vmatprep.mubr.bf16.mxu1 %v2301_v13  ;;  %1247 = vmatprep.mubr.bf16.mxu0 %v2304_v14 }
  0x66   : > { %1151 = vmatmul.mubr.bf16.gmra.mrb[28].mxu1 %v2303_v15  ;;  %1248 = vmatmul.mubr.bf16.gmra.mrb[28].mxu0 %v2306_v16 }
  0x67   : > { %1158 = vmatprep.mubr.bf16.mxu1 %v2307_v17  ;;  %1255 = vmatprep.mubr.bf16.mxu0 %v2310_v18 }
  0x6e   : > { %1159 = vmatmul.mubr.bf16.gmra.mrb[32].mxu1 %v2309_v19  ;;  %1256 = vmatmul.mubr.bf16.gmra.mrb[32].mxu0 %v2312_v20 }
  0x6f   : > { %1166 = vmatprep.mubr.bf16.mxu1 %v2313_v21  ;;  %1263 = vmatprep.mubr.bf16.mxu0 %v2316_v22 }
  0x76   : > { %1167 = vmatmul.mubr.bf16.gmra.mrb[36].mxu1 %v2315_v23  ;;  %1264 = vmatmul.mubr.bf16.gmra.mrb[36].mxu0 %v2318_v24 }
  0x77   : > { %1174 = vmatprep.mubr.bf16.mxu1 %v2319_v25  ;;  %1271 = vmatprep.mubr.bf16.mxu0 %v2322_v26  ;;  %v2793_v25 = vld [vmem:[%s3177_s2] ss:$0 sm:$0xff] }
  0x7e   : > { %1175 = vmatmul.mubr.bf16.gmra.mrb[40].mxu1 %v2321_v27  ;;  %1272 = vmatmul.mubr.bf16.gmra.mrb[40].mxu0 %v2324_v28 }
  0x7f   : > { %1182 = vmatprep.mubr.bf16.mxu1 %v2325_v29  ;;  %1279 = vmatprep.mubr.bf16.mxu0 %v2328_v30 }
  0x86   : > { %1183 = vmatmul.mubr.bf16.gmra.mrb[44].mxu1 %v2327_v31  ;;  %1280 = vmatmul.mubr.bf16.gmra.mrb[44].mxu0 %v2330_v32 }
  0x87   : > { %2111 = vmatprep.mubr.msk.bf16.mxu1 %vm972_vm0, %v2331_v33 }
  0x8e   : > { %2112 = vmatmul.mubr.msk.bf16.vlgmr.msra.gmra.mrb[48].mxu1 %vm972_vm0, %v2332_v34 }
  0x8f   : > { %2115 = vmatprep.mubr.msk.bf16.mxu1 %vm972_vm0, %v2333_v35 }
  0x96   : > { %2116 = vmatmul.mubr.msk.bf16.gmra.mrb[52].mxu1 %vm972_vm0, %v2334_v36 }
  0x97   : > { %2119 = vmatprep.mubr.msk.bf16.mxu1 %vm972_vm0, %v2335_v37 }
  0x9e   : > { %2120 = vmatmul.mubr.msk.bf16.gmra.mrb[56].mxu1 %vm972_vm0, %v2336_v38  ;;  %v2470_v38 = vmov 0.0  }
  0x9f   : > { %2123 = vmatprep.mubr.msk.bf16.mxu1 %vm972_vm0, %v2337_v39  ;;  %2127 = vmatprep.subr.bf16.mxu0 %v2470_v38 }
  0xa0   : > { %2143 = vmatprep.mubr.msk.bf16.mxu0 %vm2471_vm1, %v2470_v38 }
  0xa6   : > { %2124 = vmatmul.mubr.msk.bf16.gmra.mrb[60].mxu1 %vm972_vm0, %v2338_v40 }
 0x101   : > { %v1939_v41 = vpop.f32.mrb[0].mxu1  ;;  %v1915_v42 = vpop.f32.mrb[0].mxu0 }
 0x102   : > { %v1940_v43 = vpop.f32.mrb[1].mxu1  ;;  %v1916_v44 = vpop.f32.mrb[1].mxu0 }
 0x103   : > { %v2772_v45 = vadd.f32 %v1940_v43, %v1939_v41  ;;  %v1942_v46 = vpop.f32.mrb[2].mxu1  ;;  %v1917_v47 = vadd.f32 %v1916_v44, %v1915_v42  ;;  %v1918_v48 = vpop.f32.mrb[2].mxu0 }
 0x104   : > { %v1943_v49 = vpop.f32.mrb[3].mxu1  ;;  %v1919_v50 = vpop.f32.mrb[3].mxu0 }
 0x105   : > { %v2774_v51 = vadd.f32 %v1943_v49, %v1942_v46  ;;  %v1920_v52 = vadd.f32 %v1919_v50, %v1918_v48  ;;  %v1032_v26 = vadd.f32 %v1917_v47, %v2793_v25 }
 0x107   : > { %v1035_v31 = vadd.f32 %v1920_v52, %v2793_v25 }
 0x109   : > { %v1945_v53 = vpop.f32.mrb[4].mxu1  ;;  %v1921_v54 = vpop.f32.mrb[4].mxu0 }
 0x10a   : > { %v1946_v55 = vpop.f32.mrb[5].mxu1  ;;  %v1922_v56 = vpop.f32.mrb[5].mxu0 }
 0x10b   : > { %v2776_v57 = vadd.f32 %v1946_v55, %v1945_v53  ;;  %v1948_v58 = vpop.f32.mrb[6].mxu1  ;;  %v1923_v59 = vadd.f32 %v1922_v56, %v1921_v54  ;;  %v1924_v60 = vpop.f32.mrb[6].mxu0 }
 0x10c   : > { %v1949_v61 = vpop.f32.mrb[7].mxu1  ;;  %v1925_v62 = vpop.f32.mrb[7].mxu0 }
 0x10d   : > { %v2778_v63 = vadd.f32 %v1949_v61, %v1948_v58  ;;  %v1926_v0 = vadd.f32 %v1925_v62, %v1924_v60  ;;  %v1040_v44 = vadd.f32 %v1923_v59, %v2793_v25 }
 0x10f   : > { %v1043_v52 = vadd.f32 %v1926_v0, %v2793_v25 }
 0x111   : > { %v1951_v1 = vpop.f32.mrb[8].mxu1  ;;  %v1927_v2 = vpop.f32.mrb[8].mxu0 }
 0x112   : > { %v1952_v3 = vpop.f32.mrb[9].mxu1  ;;  %v1928_v4 = vpop.f32.mrb[9].mxu0 }
 0x113   : > { %v2780_v5 = vadd.f32 %v1952_v3, %v1951_v1  ;;  %v1954_v6 = vpop.f32.mrb[10].mxu1  ;;  %v1929_v7 = vadd.f32 %v1928_v4, %v1927_v2  ;;  %v1930_v8 = vpop.f32.mrb[10].mxu0 }
 0x114   : > { %v1955_v9 = vpop.f32.mrb[11].mxu1  ;;  %v1931_v10 = vpop.f32.mrb[11].mxu0 }
 0x115   : > { %v2782_v11 = vadd.f32 %v1955_v9, %v1954_v6  ;;  %v1932_v12 = vadd.f32 %v1931_v10, %v1930_v8  ;;  %v1048_v59 = vadd.f32 %v1929_v7, %v2793_v25 }
 0x117   : > { %v1051_v10 = vadd.f32 %v1932_v12, %v2793_v25 }
 0x119   : > { %v1957_v13 = vpop.f32.mrb[12].mxu1  ;;  %v1933_v14 = vpop.f32.mrb[12].mxu0 }
 0x11a   : > { %v1958_v15 = vpop.f32.mrb[13].mxu1  ;;  %v1934_v16 = vpop.f32.mrb[13].mxu0 }
 0x11b   : > { %v2784_v17 = vadd.f32 %v1958_v15, %v1957_v13  ;;  %v1960_v18 = vpop.f32.mrb[14].mxu1  ;;  %v1935_v19 = vadd.f32 %v1934_v16, %v1933_v14  ;;  %v1936_v20 = vpop.f32.mrb[14].mxu0 }
 0x11c   : > { %v1961_v21 = vpop.f32.mrb[15].mxu1  ;;  %v1937_v22 = vpop.f32.mrb[15].mxu0 }
 0x11d   : > { %v2786_v23 = vadd.f32 %v1961_v21, %v1960_v18  ;;  %v2788_v24 = vadd.f32 %v1937_v22, %v1936_v20  ;;  %v1056_v7 = vadd.f32 %v1935_v19, %v2793_v25 }
 0x121   : > { %v1979_v27 = vpop.f32.mrb[16].mxu1  ;;  %v2043_v28 = vpop.f32.mrb[16].mxu0 }
 0x122   : > { %v1980_v29 = vpop.f32.mrb[17].mxu1  ;;  %v2044_v30 = vpop.f32.mrb[17].mxu0 }
 0x123   : > { %v1981_v32 = vadd.f32 %v1980_v29, %v1979_v27  ;;  %v1982_v33 = vpop.f32.mrb[18].mxu1  ;;  %v2045_v34 = vadd.f32 %v2044_v30, %v2043_v28  ;;  %v2046_v35 = vpop.f32.mrb[18].mxu0 }
 0x124   : > { %v1983_v36 = vpop.f32.mrb[19].mxu1  ;;  %v2047_v37 = vpop.f32.mrb[19].mxu0 }
 0x125   : > { %v1129_v39 = vadd.f32 %v1981_v32, %v1032_v26  ;;  %v1984_v40 = vadd.f32 %v1983_v36, %v1982_v33  ;;  %v2048_v41 = vadd.f32 %v2047_v37, %v2046_v35  ;;  %v1059_v33 = vadd.f32 %v2788_v24, %v2793_v25 }
 0x126   : > { %v1064_v24 = vadd.f32 %v2772_v45, %v2793_v25 }
 0x127   : > { %v1132_v42 = vadd.f32 %v1984_v40, %v1035_v31  ;;  %v2798_v43 = vadd.f32 %v2045_v34, %v1129_v39 }
 0x129   : > { %v1985_v46 = vpop.f32.mrb[20].mxu1  ;;  %v2049_v47 = vpop.f32.mrb[20].mxu0  ;;  %v2801_v48 = vadd.f32 %v2048_v41, %v1132_v42 }
 0x12a   : > { %v1986_v49 = vpop.f32.mrb[21].mxu1  ;;  %v2050_v50 = vpop.f32.mrb[21].mxu0 }
 0x12b   : > { %v1987_v53 = vadd.f32 %v1986_v49, %v1985_v46  ;;  %v1988_v54 = vpop.f32.mrb[22].mxu1  ;;  %v2051_v55 = vadd.f32 %v2050_v50, %v2049_v47  ;;  %v2052_v56 = vpop.f32.mrb[22].mxu0 }
 0x12c   : > { %v1989_v58 = vpop.f32.mrb[23].mxu1  ;;  %v2053_v60 = vpop.f32.mrb[23].mxu0 }
 0x12d   : > { %v1137_v61 = vadd.f32 %v1987_v53, %v1040_v44  ;;  %v1990_v62 = vadd.f32 %v1989_v58, %v1988_v54  ;;  %v2054_v1 = vadd.f32 %v2053_v60, %v2052_v56 }
 0x12f   : > { %v1140_v2 = vadd.f32 %v1990_v62, %v1043_v52  ;;  %v2804_v3 = vadd.f32 %v2051_v55, %v1137_v61  ;;  %v1067_v62 = vadd.f32 %v2774_v51, %v2793_v25 }
 0x131   : > { %v1991_v4 = vpop.f32.mrb[24].mxu1  ;;  %v2055_v6 = vpop.f32.mrb[24].mxu0  ;;  %v2807_v8 = vadd.f32 %v2054_v1, %v1140_v2 }
 0x132   : > { %v1992_v9 = vpop.f32.mrb[25].mxu1  ;;  %v2056_v0 = vpop.f32.mrb[25].mxu0 }
 0x133   : > { %v1993_v13 = vadd.f32 %v1992_v9, %v1991_v4  ;;  %v1994_v14 = vpop.f32.mrb[26].mxu1  ;;  %v2057_v15 = vadd.f32 %v2056_v0, %v2055_v6  ;;  %v2058_v16 = vpop.f32.mrb[26].mxu0 }
 0x134   : > { %v1995_v18 = vpop.f32.mrb[27].mxu1  ;;  %v2059_v20 = vpop.f32.mrb[27].mxu0 }
 0x135   : > { %v1145_v21 = vadd.f32 %v1993_v13, %v1048_v59  ;;  %v1996_v22 = vadd.f32 %v1995_v18, %v1994_v14  ;;  %v2060_v26 = vadd.f32 %v2059_v20, %v2058_v16  ;;  %v1072_v14 = vadd.f32 %v2776_v57, %v2793_v25 }
 0x137   : > { %v1148_v27 = vadd.f32 %v1996_v22, %v1051_v10  ;;  %v2810_v28 = vadd.f32 %v2057_v15, %v1145_v21  ;;  %v1075_v22 = vadd.f32 %v2778_v63, %v2793_v25 }
 0x139   : > { %v1997_v29 = vpop.f32.mrb[28].mxu1  ;;  %v2061_v30 = vpop.f32.mrb[28].mxu0  ;;  %v2813_v31 = vadd.f32 %v2060_v26, %v1148_v27 }
 0x13a   : > { %v1998_v32 = vpop.f32.mrb[29].mxu1  ;;  %v2062_v12 = vpop.f32.mrb[29].mxu0 }
 0x13b   : > { %v1999_v34 = vadd.f32 %v1998_v32, %v1997_v29  ;;  %v2000_v35 = vpop.f32.mrb[30].mxu1  ;;  %v2063_v36 = vadd.f32 %v2062_v12, %v2061_v30  ;;  %v2064_v37 = vpop.f32.mrb[30].mxu0 }
 0x13c   : > { %v2001_v39 = vpop.f32.mrb[31].mxu1  ;;  %v2065_v40 = vpop.f32.mrb[31].mxu0 }
 0x13d   : > { %v1153_v41 = vadd.f32 %v1999_v34, %v1056_v7  ;;  %v2002_v42 = vadd.f32 %v2001_v39, %v2000_v35  ;;  %v2066_v44 = vadd.f32 %v2065_v40, %v2064_v37  ;;  %v1636_v35 = vld [vmem:[%s3179_s4 + $0x8] sm:$0xff] }
 0x13f   : > { %v1156_v46 = vadd.f32 %v2002_v42, %v1059_v33  ;;  %v2817_v19 = vadd.f32 %v2063_v36, %v1153_v41  ;;  %v1080_v36 = vadd.f32 %v2780_v5, %v2793_v25  ;;  %v2472_v41 = vmov 0  }
 0x140   : > { %2209 = vset.pattern.permute.xlu0 %v2472_v41 }
 0x141   : > { %v2003_v47 = vpop.f32.mrb[32].mxu1  ;;  %v2067_v49 = vpop.f32.mrb[32].mxu0  ;;  %v2819_v50 = vadd.f32 %v2066_v44, %v1156_v46  ;;  %1644 = vperm.xlu0 %2209, %v1636_v35   ;;  %v1083_v46 = vadd.f32 %v2782_v11, %v2793_v25  ;;  %v1088_v11 = vadd.f32 %v2784_v17, %v2793_v25 }
 0x142   : > { %v2004_v52 = vpop.f32.mrb[33].mxu1  ;;  %v2068_v53 = vpop.f32.mrb[33].mxu0 }
 0x143   : > { %v2005_v54 = vadd.f32 %v2004_v52, %v2003_v47  ;;  %v2006_v55 = vpop.f32.mrb[34].mxu1  ;;  %v2069_v56 = vadd.f32 %v2068_v53, %v2067_v49  ;;  %v2070_v58 = vpop.f32.mrb[34].mxu0  ;;  %v1635_v53 = vld [vmem:[%s3179_s4] sm:$0xff] }
 0x144   : > { %v2007_v60 = vpop.f32.mrb[35].mxu1  ;;  %v2071_v61 = vpop.f32.mrb[35].mxu0 }
 0x145   : > { %v1161_v1 = vadd.f32 %v2005_v54, %v1064_v24  ;;  %v2008_v2 = vadd.f32 %v2007_v60, %v2006_v55  ;;  %v2072_v59 = vadd.f32 %v2071_v61, %v2070_v58  ;;  %1639 = vperm.xlu0 %2209, %v1635_v53  }
 0x147   : > { %v1164_v4 = vadd.f32 %v2008_v2, %v1067_v62  ;;  %v2825_v6 = vadd.f32 %v2069_v56, %v1161_v1 }
 0x149   : > { %v2009_v9 = vpop.f32.mrb[36].mxu1  ;;  %v2073_v0 = vpop.f32.mrb[36].mxu0  ;;  %v2827_v10 = vadd.f32 %v2072_v59, %v1164_v4 }
 0x14a   : > { %v2010_v45 = vpop.f32.mrb[37].mxu1  ;;  %v2074_v13 = vpop.f32.mrb[37].mxu0 }
 0x14b   : > { %v2011_v15 = vadd.f32 %v2010_v45, %v2009_v9  ;;  %v2012_v16 = vpop.f32.mrb[38].mxu1  ;;  %v2075_v18 = vadd.f32 %v2074_v13, %v2073_v0  ;;  %v2076_v20 = vpop.f32.mrb[38].mxu0  ;;  %v1091_v9 = vadd.f32 %v2786_v23, %v2793_v25 }
 0x14c   : > { %v2013_v51 = vpop.f32.mrb[39].mxu1  ;;  %v2077_v21 = vpop.f32.mrb[39].mxu0 }
 0x14d   : > { %v1169_v26 = vadd.f32 %v2011_v15, %v1072_v14  ;;  %v2014_v27 = vadd.f32 %v2013_v51, %v2012_v16  ;;  %v2078_v7 = vadd.f32 %v2077_v21, %v2076_v20 }
 0x14f   : > { %v1172_v29 = vadd.f32 %v2014_v27, %v1075_v22  ;;  %v2834_v30 = vadd.f32 %v2075_v18, %v1169_v26 }
 0x151   : > { %v2015_v32 = vpop.f32.mrb[40].mxu1  ;;  %v2079_v57 = vpop.f32.mrb[40].mxu0  ;;  %v2836_v12 = vadd.f32 %v2078_v7, %v1172_v29 }
 0x152   : > { %v2016_v33 = vpop.f32.mrb[41].mxu1  ;;  %v2080_v34 = vpop.f32.mrb[41].mxu0 }
 0x153   : > { %v2017_v63 = vadd.f32 %v2016_v33, %v2015_v32  ;;  %v2018_v37 = vpop.f32.mrb[42].mxu1  ;;  %v2081_v39 = vadd.f32 %v2080_v34, %v2079_v57  ;;  %v2082_v40 = vpop.f32.mrb[42].mxu0 }
 0x154   : > { %v2019_v42 = vpop.f32.mrb[43].mxu1  ;;  %v2083_v44 = vpop.f32.mrb[43].mxu0 }
 0x155   : > { %v1177_v47 = vadd.f32 %v2017_v63, %v1080_v36  ;;  %v2020_v49 = vadd.f32 %v2019_v42, %v2018_v37  ;;  %v2084_v52 = vadd.f32 %v2083_v44, %v2082_v40 }
 0x157   : > { %v1180_v5 = vadd.f32 %v2020_v49, %v1083_v46  ;;  %v2848_v24 = vadd.f32 %v2081_v39, %v1177_v47 }
 0x159   : > { %v2021_v54 = vpop.f32.mrb[44].mxu1  ;;  %v2085_v55 = vpop.f32.mrb[44].mxu0  ;;  %v2850_v56 = vadd.f32 %v2084_v52, %v1180_v5 }
 0x15a   : > { %v2022_v58 = vpop.f32.mrb[45].mxu1  ;;  %v2086_v60 = vpop.f32.mrb[45].mxu0 }
 0x15b   : > { %v2023_v61 = vadd.f32 %v2022_v58, %v2021_v54  ;;  %v2024_v62 = vpop.f32.mrb[46].mxu1  ;;  %v2087_v1 = vadd.f32 %v2086_v60, %v2085_v55  ;;  %v2088_v2 = vpop.f32.mrb[46].mxu0 }
 0x15c   : > { %v2025_v59 = vpop.f32.mrb[47].mxu1  ;;  %v2089_v4 = vpop.f32.mrb[47].mxu0 }
 0x15d   : > { %v1185_v0 = vadd.f32 %v2023_v61, %v1088_v11  ;;  %v2026_v45 = vadd.f32 %v2025_v59, %v2024_v62  ;;  %v2090_v13 = vadd.f32 %v2089_v4, %v2088_v2 }
 0x15f   : > { %v1188_v14 = vadd.f32 %v2026_v45, %v1091_v9  ;;  %v2856_v15 = vadd.f32 %v2087_v1, %v1185_v0 }
 0x161   : > { %v2113_v16 = vpop.f32.mrb[48].mxu1  ;;  %v2858_v18 = vadd.f32 %v2090_v13, %v1188_v14 }
 0x162   : > { %v2861_v17 = vadd.f32 %v2113_v16, %v2804_v3  ;;  %v1322_v20 = vpop.f32.mrb[49].mxu1 }
 0x163   : > { %v2864_v51 = vadd.f32 %v1322_v20, %v2798_v43  ;;  %v2114_v21 = vpop.f32.mrb[50].mxu1 }
 0x164   : > { %v1403_v22 = vand.u32 2147483647, %v2861_v17  ;;  %v2868_v23 = vadd.f32 %v2114_v21, %v2807_v8  ;;  %v1325_v25 = vpop.f32.mrb[51].mxu1  ;;  %v1387_v45 = vmax.f32 %v2861_v17, 0.0 }
 0x165   : > { %v1401_v26 = vand.u32 2147483647, %v2864_v51  ;;  %v2872_v27 = vadd.f32 %v1325_v25, %v2801_v48  ;;  %v1385_v16 = vmax.f32 %v2864_v51, 0.0 }
 0x166   : > { %v1419_v7 = vsub.f32 0.0, %v1403_v22  ;;  %v1404_v3 = vand.u32 2147483647, %v2868_v23  ;;  %v1388_v25 = vmax.f32 %v2868_v23, 0.0 }
 0x167   : > { %v1417_v29 = vsub.f32 0.0, %v1401_v26  ;;  %v1402_v32 = vand.u32 2147483647, %v2872_v27 }
 0x168   : > { %v1437_v43 = vmul.f32 1.442695, %v1419_v7  ;;  %v1420_v57 = vsub.f32 0.0, %v1404_v3 }
 0x169   : > { %v1433_v33 = vmul.f32 1.442695, %v1417_v29  ;;  %v1418_v34 = vsub.f32 0.0, %v1402_v32  ;;  %v2117_v35 = vpop.f32.mrb[52].mxu1 }
 0x16a   : > { %2340 = vpow2.f32 %v1437_v43  ;;  %v1439_v8 = vmul.f32 1.442695, %v1420_v57  ;;  %v2877_v36 = vadd.f32 %v2117_v35, %v2817_v19  ;;  %v1338_v63 = vpop.f32.mrb[53].mxu1  ;;  %v1386_v43 = vmax.f32 %v2872_v27, 0.0 }
 0x16b   : > { %2342 = vpow2.f32 %v1433_v33  ;;  %v1435_v48 = vmul.f32 1.442695, %v1418_v34  ;;  %v2880_v37 = vadd.f32 %v1338_v63, %v2810_v28  ;;  %v2118_v39 = vpop.f32.mrb[54].mxu1 }
 0x16c   : > { %2344 = vpow2.f32 %v1439_v8  ;;  %v1407_v40 = vand.u32 2147483647, %v2877_v36  ;;  %v2884_v41 = vadd.f32 %v2118_v39, %v2819_v50  ;;  %v1341_v42 = vpop.f32.mrb[55].mxu1  ;;  %v1391_v57 = vmax.f32 %v2877_v36, 0.0 }
 0x16d   : > { %2346 = vpow2.f32 %v1435_v48  ;;  %v1405_v44 = vand.u32 2147483647, %v2880_v37  ;;  %v2888_v19 = vadd.f32 %v1341_v42, %v2813_v31  ;;  %v1389_v33 = vmax.f32 %v2880_v37, 0.0 }
 0x16e   : > { %v1423_v46 = vsub.f32 0.0, %v1407_v40  ;;  %v1408_v47 = vand.u32 2147483647, %v2884_v41  ;;  %v1392_v8 = vmax.f32 %v2884_v41, 0.0 }
 0x16f   : > { %v1421_v49 = vsub.f32 0.0, %v1405_v44  ;;  %v1406_v28 = vand.u32 2147483647, %v2888_v19  ;;  %v1390_v44 = vmax.f32 %v2888_v19, 0.0 }
 0x170   : > { %v1445_v52 = vmul.f32 1.442695, %v1423_v46  ;;  %v1424_v53 = vsub.f32 0.0, %v1408_v47 }
 0x171   : > { %v1441_v5 = vmul.f32 1.442695, %v1421_v49  ;;  %v1422_v54 = vsub.f32 0.0, %v1406_v28  ;;  %v2121_v55 = vpop.f32.mrb[56].mxu1 }
 0x172   : > { %2348 = vpow2.f32 %v1445_v52  ;;  %v1447_v50 = vmul.f32 1.442695, %v1424_v53  ;;  %v2893_v58 = vadd.f32 %v2121_v55, %v2834_v30  ;;  %v1354_v60 = vpop.f32.mrb[57].mxu1 }
 0x173   : > { %2350 = vpow2.f32 %v1441_v5  ;;  %v1443_v31 = vmul.f32 1.442695, %v1422_v54  ;;  %v2896_v11 = vadd.f32 %v1354_v60, %v2825_v6  ;;  %v2122_v61 = vpop.f32.mrb[58].mxu1 }
 0x174   : > { %v2341_v62 = vpop.eup %2340  ;;  %2352 = vpow2.f32 %v1447_v50  ;;  %v1411_v1 = vand.u32 2147483647, %v2893_v58  ;;  %v2900_v2 = vadd.f32 %v2122_v61, %v2836_v12  ;;  %v2902_v59 = vpop.f32.mrb[59].mxu1 }
 0x175   : > { %v2343_v4 = vpop.eup %2342  ;;  %v1483_v9 = vadd.f32 1.0, %v2341_v62  ;;  %v1486_v30 = vmul.f32 -0.5, %v2341_v62  ;;  %2354 = vpow2.f32 %v1443_v31  ;;  %v1489_v22 = vand.u32 2147483647, %v2341_v62 }
 0x176   : > { %v2345_v0 = vpop.eup %2344  ;;  %v1465_v13 = vadd.f32 1.0, %v2343_v4  ;;  %v1468_v6 = vmul.f32 -0.5, %v2343_v4  ;;  %v1427_v21 = vsub.f32 0.0, %v1411_v1  ;;  %v1471_v12 = vand.u32 2147483647, %v2343_v4 }
 0x177   : > { %v2347_v14 = vpop.eup %2346  ;;  %2356 = vlog2.f32 %v1483_v9  ;;  %v1492_v20 = vadd.f32 1.0, %v2345_v0  ;;  %v1487_v26 = vadd.f32 1.0, %v1486_v30  ;;  %v1495_v32 = vmul.f32 -0.5, %v2345_v0 }
 0x178   : > { %2358 = vlog2.f32 %v1465_v13  ;;  %v1469_v7 = vadd.f32 1.0, %v1468_v6  ;;  %v1474_v3 = vadd.f32 1.0, %v2347_v14  ;;  %v1477_v35 = vmul.f32 -0.5, %v2347_v14 }
 0x179   : > { %2360 = vlog2.f32 %v1492_v20  ;;  %v2907_v29 = vpop.f32.mrb[60].mxu1  ;;  %v1453_v63 = vmul.f32 1.442695, %v1427_v21  ;;  %vm2919_vm2 = vcmp.lt.f32.partialorder %v1489_v22, 0.0004427343  ;;  %v1488_v49 = vmul.f32 %v2341_v62, %v1487_v26 }
 0x17a   : > { %v2912_v34 = vpop.f32.mrb[61].mxu1  ;;  %2362 = vlog2.f32 %v1474_v3  ;;  %v1498_v42 = vand.u32 2147483647, %v2345_v0  ;;  %v1470_v28 = vmul.f32 %v2343_v4, %v1469_v7  ;;  %vm2928_vm3 = vcmp.lt.f32.partialorder %v1471_v12, 0.0004427343 }
 0x17b   : > { %v2915_v48 = vpop.f32.mrb[62].mxu1  ;;  %v1496_v54 = vadd.f32 1.0, %v1495_v32  ;;  %v1480_v55 = vand.u32 2147483647, %v2347_v14  ;;  %2364 = vpow2.f32 %v1453_v63  ;;  %v1478_v31 = vadd.f32 1.0, %v1477_v35 }
 0x17c   : > { %v2917_v39 = vpop.eup %2348  ;;  %v2924_v46 = vpop.f32.mrb[63].mxu1  ;;  %vm2940_vm4 = vcmp.lt.f32.partialorder %v1498_v42, 0.0004427343  ;;  %v1409_v9 = vand.u32 2147483647, %v2896_v11  ;;  %v2998_v27 = vadd.f32 %v2902_v59, %v2827_v10 }
 0x17d   : > { %v2926_v47 = vpop.eup %2350  ;;  %v1519_v53 = vadd.f32 1.0, %v2917_v39  ;;  %v1522_v61 = vmul.f32 -0.5, %v2917_v39  ;;  %v1525_v4 = vand.u32 2147483647, %v2917_v39  ;;  %v1497_v12 = vmul.f32 %v2345_v0, %v1496_v54 }
 0x17e   : > { %v2933_v5 = vpop.eup %2352  ;;  %v1501_v50 = vadd.f32 1.0, %v2926_v47  ;;  %v1504_v13 = vmul.f32 -0.5, %v2926_v47  ;;  %v1507_v6 = vand.u32 2147483647, %v2926_v47  ;;  %vm2949_vm5 = vcmp.lt.f32.partialorder %v1480_v55, 0.0004427343 }
 0x17f   : > { %v2936_v60 = vpop.eup %2354  ;;  %2366 = vlog2.f32 %v1519_v53  ;;  %v1528_v62 = vadd.f32 1.0, %v2933_v5  ;;  %v1531_v7 = vmul.f32 -0.5, %v2933_v5  ;;  %v1479_v35 = vmul.f32 %v2347_v14, %v1478_v31 }
 0x180   : > { %2368 = vlog2.f32 %v1501_v50  ;;  %v1510_v20 = vadd.f32 1.0, %v2936_v60  ;;  %v1523_v63 = vadd.f32 1.0, %v1522_v61  ;;  %vm2956_vm6 = vcmp.lt.f32.partialorder %v1525_v4, 0.0004427343 }
 0x181   : > { %v2357_v30 = vpop.eup %2356  ;;  %2370 = vlog2.f32 %v1528_v62  ;;  %v1513_v0 = vmul.f32 -0.5, %v2936_v60  ;;  %v1505_v62 = vadd.f32 1.0, %v1504_v13  ;;  %vm2963_vm7 = vcmp.lt.f32.partialorder %v1507_v6, 0.0004427343 }
 0x182   : > { %v2359_v21 = vpop.eup %2358  ;;  %v1485_v22 = vmul.f32 0.6931472, %v2357_v30  ;;  %2372 = vlog2.f32 %v1510_v20  ;;  %v1425_v14 = vsub.f32 0.0, %v1409_v9  ;;  %v1532_v31 = vadd.f32 1.0, %v1531_v7 }
 0x183   : > { %v2361_v3 = vpop.eup %2360  ;;  %v1467_v32 = vmul.f32 0.6931472, %v2359_v21  ;;  %v1534_v61 = vand.u32 2147483647, %v2933_v5  ;;  %v1412_v13 = vand.u32 2147483647, %v2900_v2  ;;  %v1524_v51 = vmul.f32 %v2917_v39, %v1523_v63 }
 0x184   : > { %v1491_v42 = vsel %vm2919_vm2, %v1488_v49, %v1485_v22  ;;  %v1494_v53 = vmul.f32 0.6931472, %v2361_v3  ;;  %v2363_v54 = vpop.eup %2362  ;;  %v1449_v52 = vmul.f32 1.442695, %v1425_v14  ;;  %v1514_v20 = vadd.f32 1.0, %v1513_v0 }
 0x185   : > { %v1473_v55 = vsel %vm2928_vm3, %v1470_v28, %v1467_v32  ;;  %v1476_v49 = vmul.f32 0.6931472, %v2363_v54  ;;  %v2972_v4 = vadd.f32 %v1491_v42, %v1387_v45  ;;  %v2979_v6 = vpop.eup %2364  ;;  %v1516_v17 = vand.u32 2147483647, %v2936_v60 }
 0x186   : > { %v1500_v40 = vsel %vm2940_vm4, %v1497_v12, %v1494_v53  ;;  %v1609_v1 = vadd.f32 %v1473_v55, %v1385_v16  ;;  %2374 = vpow2.f32 %v1449_v52  ;;  %v1428_v21 = vsub.f32 0.0, %v1412_v13 }
 0x187   : > { %v2976_v28 = vadd.f32 %v1500_v40, %v1388_v25  ;;  %v1482_v9 = vsel %vm2949_vm5, %v1479_v35, %v1476_v49  ;;  %v1506_v16 = vmul.f32 %v2926_v47, %v1505_v62  ;;  %vm2992_vm8 = vcmp.lt.f32.partialorder %v1534_v61, 0.0004427343 }
 0x188   : > { %v1610_v25 = vadd.f32 %v1482_v9, %v1386_v43  ;;  %v1455_v35 = vmul.f32 1.442695, %v1428_v21  ;;  %v1533_v39 = vmul.f32 %v2933_v5, %v1532_v31  ;;  %v3005_v47 = vadd.f32 %v2907_v29, %v2856_v15 }
 0x189   : > { %v2367_v45 = vpop.eup %2366  ;;  %v1628_v23 = vpack.c.bf16 %v2976_v28, %v2972_v4  ;;  %v1515_v53 = vmul.f32 %v2936_v60, %v1514_v20  ;;  %vm3008_vm9 = vcmp.lt.f32.partialorder %v1516_v17, 0.0004427343  ;;  %v1555_v10 = vadd.f32 1.0, %v2979_v6 }
 0x18a   : > { %v2369_v22 = vpop.eup %2368  ;;  %v1521_v12 = vmul.f32 0.6931472, %v2367_v45  ;;  %v1627_v3 = vpack.c.bf16 %v1610_v25, %v1609_v1  ;;  %2376 = vpow2.f32 %v1455_v35  ;;  %v1410_v15 = vand.u32 2147483647, %v2998_v27 }
 0x18b   : > { %v2371_v7 = vpop.eup %2370  ;;  %v1503_v32 = vmul.f32 0.6931472, %v2369_v22  ;;  %v1415_v54 = vand.u32 2147483647, %v3005_v47  ;;  %v3030_v55 = vadd.f32 %v2912_v34, %v2848_v24  ;;  %v3036_v14 = vadd.f32 %v2915_v48, %v2858_v18 }
 0x18c   : > { %v1527_v43 = vsel %vm2956_vm6, %v1524_v51, %v1521_v12  ;;  %v1530_v42 = vmul.f32 0.6931472, %v2371_v7  ;;  %v2373_v63 = vpop.eup %2372  ;;  %2128 = vmatpush3.bf16.xpose.msra.mxu0 %v1627_v3  ;;  %v1426_v30 = vsub.f32 0.0, %v1410_v15  ;;  %v3040_v36 = vadd.f32 %v2924_v46, %v2850_v56 }
 0x18d   : > { %v1509_v59 = vsel %vm2963_vm7, %v1506_v16, %v1503_v32  ;;  %v1512_v50 = vmul.f32 0.6931472, %v2373_v63  ;;  %2129 = vmatprep.subr.bf16.mxu0 %v2470_v38  ;;  %v3021_v29 = vadd.f32 %v1527_v43, %v1391_v57  ;;  %v1431_v34 = vsub.f32 0.0, %v1415_v54 }
 0x18e   : > { %v1536_v5 = vsel %vm2992_vm8, %v1533_v39, %v1530_v42  ;;  %v1613_v41 = vadd.f32 %v1509_v59, %v1389_v33  ;;  %2378 = vlog2.f32 %v1555_v10  ;;  %v1413_v40 = vand.u32 2147483647, %v3030_v55 }
 0x18f   : > { %v3025_v60 = vadd.f32 %v1536_v5, %v1392_v8  ;;  %v1518_v62 = vsel %vm3008_vm9, %v1515_v53, %v1512_v50  ;;  %v1451_v8 = vmul.f32 1.442695, %v1426_v30  ;;  %v1461_v49 = vmul.f32 1.442695, %v1431_v34 }
 0x190   : > { %v1614_v24 = vadd.f32 %v1518_v62, %v1390_v44  ;;  %v3049_v18 = vpop.eup %2374  ;;  %v1416_v56 = vand.u32 2147483647, %v3036_v14  ;;  %v1414_v37 = vand.u32 2147483647, %v3040_v36  ;;  %v1429_v46 = vsub.f32 0.0, %v1413_v40 }
 0x191   : > { %v1630_v57 = vpack.c.bf16 %v3025_v60, %v3021_v29  ;;  %v1537_v33 = vadd.f32 1.0, %v3049_v18  ;;  %2380 = vpow2.f32 %v1451_v8  ;;  %v1558_v13 = vmul.f32 -0.5, %v2979_v6 }
 0x192   : > { %v1629_v48 = vpack.c.bf16 %v1614_v24, %v1613_v41  ;;  %2382 = vpow2.f32 %v1461_v49  ;;  %v1432_v19 = vsub.f32 0.0, %v1416_v56  ;;  %v1430_v44 = vsub.f32 0.0, %v1414_v37 }
 0x193   : > { %v1457_v61 = vmul.f32 1.442695, %v1429_v46  ;;  %2384 = vlog2.f32 %v1537_v33  ;;  %v1559_v45 = vadd.f32 1.0, %v1558_v13  ;;  %v1561_v25 = vand.u32 2147483647, %v2979_v6 }
 0x194   : > { %2130 = vmatpush3.bf16.xpose.msra.mxu0 %v1628_v23  ;;  %v2377_v31 = vpop.eup %2376  ;;  %v1463_v4 = vmul.f32 1.442695, %v1432_v19  ;;  %v1459_v52 = vmul.f32 1.442695, %v1430_v44  ;;  %v1540_v12 = vmul.f32 -0.5, %v3049_v18  ;;  %v1395_v3 = vmax.f32 %v2893_v58, 0.0 }
 0x195   : > { %2131 = vmatprep.subr.bf16.mxu0 %v2470_v38  ;;  %v1564_v28 = vadd.f32 1.0, %v2377_v31  ;;  %2386 = vpow2.f32 %v1457_v61  ;;  %v1567_v9 = vmul.f32 -0.5, %v2377_v31  ;;  %v1570_v26 = vand.u32 2147483647, %v2377_v31 }
 0x196   : > { %v1560_v32 = vmul.f32 %v2979_v6, %v1559_v45  ;;  %vm3066_vm10 = vcmp.lt.f32.partialorder %v1561_v25, 0.0004427343  ;;  %v1396_v42 = vmax.f32 %v2900_v2, 0.0  ;;  %v1541_v10 = vadd.f32 1.0, %v1540_v12 }
 0x197   : > { %2388 = vlog2.f32 %v1564_v28  ;;  %v1568_v51 = vadd.f32 1.0, %v1567_v9  ;;  %v1543_v5 = vand.u32 2147483647, %v3049_v18  ;;  %vm1571_vm11 = vcmp.lt.f32.partialorder %v1570_v26, 0.0004427343 }
 0x198   : > { %2390 = vpow2.f32 %v1463_v4  ;;  %v2379_v1 = vpop.eup %2378  ;;  %v1542_v30 = vmul.f32 %v3049_v18, %v1541_v10  ;;  %v1393_v56 = vmax.f32 %v2896_v11, 0.0  ;;  %v1394_v46 = vmax.f32 %v2998_v27, 0.0 }
 0x199   : > { %2392 = vpow2.f32 %v1459_v52  ;;  %v1557_v22 = vmul.f32 0.6931472, %v2379_v1  ;;  %v1569_v58 = vmul.f32 %v2377_v31, %v1568_v51  ;;  %vm1544_vm12 = vcmp.lt.f32.partialorder %v1543_v5, 0.0004427343 }
 0x19b   : > { %v2381_v20 = vpop.eup %2380  ;;  %v1563_v0 = vsel %vm3066_vm10, %v1560_v32, %v1557_v22  ;;  %v1399_v22 = vmax.f32 %v3005_v47, 0.0 }
 0x19c   : > { %2132 = vmatpush3.bf16.xpose.msra.mxu0 %v1629_v48  ;;  %v3057_v17 = vpop.eup %2382  ;;  %v1546_v23 = vadd.f32 1.0, %v2381_v20  ;;  %v1549_v39 = vmul.f32 -0.5, %v2381_v20  ;;  %v3082_v60 = vadd.f32 %v1563_v0, %v1395_v3  ;;  %v1552_v41 = vand.u32 2147483647, %v2381_v20 }
 0x19d   : > { %2133 = vmatprep.subr.bf16.mxu0 %v2470_v38  ;;  %v1591_v21 = vadd.f32 1.0, %v3057_v17  ;;  %v2385_v16 = vpop.eup %2384  ;;  %v1597_v61 = vand.u32 2147483647, %v3057_v17 }
 0x19e   : > { %2394 = vlog2.f32 %v1546_v23  ;;  %v1539_v50 = vmul.f32 0.6931472, %v2385_v16  ;;  %v1550_v62 = vadd.f32 1.0, %v1549_v39  ;;  %vm1553_vm13 = vcmp.lt.f32.partialorder %v1552_v41, 0.0004427343 }
 0x19f   : > { %2396 = vlog2.f32 %v1591_v21  ;;  %v3062_v7 = vpop.eup %2386  ;;  %vm3101_vm14 = vcmp.lt.f32.partialorder %v1597_v61, 0.0004427343  ;;  %v1400_v16 = vmax.f32 %v3036_v14, 0.0  ;;  %v1397_v14 = vmax.f32 %v3030_v55, 0.0  ;;  %v2339_v55 = vld [vmem:[%s3178_s3] sm:$0xff]  }
 0x1a0   : > { %v1573_v63 = vadd.f32 1.0, %v3062_v7  ;;  %v1576_v34 = vmul.f32 -0.5, %v3062_v7  ;;  %v1545_v40 = vsel %vm1544_vm12, %v1542_v30, %v1539_v50  ;;  %v1551_v33 = vmul.f32 %v2381_v20, %v1550_v62 }
 0x1a1   : > { %v2389_v35 = vpop.eup %2388  ;;  %v1617_v44 = vadd.f32 %v1545_v40, %v1393_v56  ;;  %v1579_v13 = vand.u32 2147483647, %v3062_v7  ;;  %v1398_v39 = vmax.f32 %v3040_v36, 0.0 }
 0x1a2   : > { %v3072_v53 = vpop.eup %2390  ;;  %v1566_v59 = vmul.f32 0.6931472, %v2389_v35  ;;  %2398 = vlog2.f32 %v1573_v63  ;;  %v1577_v4 = vadd.f32 1.0, %v1576_v34 }
 0x1a3   : > { %v3076_v6 = vpop.eup %2392  ;;  %v1600_v2 = vadd.f32 1.0, %v3072_v53  ;;  %v1603_v48 = vmul.f32 -0.5, %v3072_v53  ;;  %v1606_v11 = vand.u32 2147483647, %v3072_v53  ;;  %vm3109_vm15 = vcmp.lt.f32.partialorder %v1579_v13, 0.0004427343 }
 0x1a4   : > { %2134 = vmatpush3.bf16.xpose.msra.mxu0 %v1630_v57  ;;  %v1572_v15 = vsel %vm1571_vm11, %v1569_v58, %v1566_v59  ;;  %v1582_v29 = vadd.f32 1.0, %v3076_v6  ;;  %v1594_v57 = vmul.f32 -0.5, %v3057_v17  ;;  %v1585_v18 = vmul.f32 -0.5, %v3076_v6 }
 0x1a5   : > { %2135 = vmatprep.subr.bf16.mxu0 %v2470_v38  ;;  %v3084_v54 = vadd.f32 %v1572_v15, %v1396_v42  ;;  %2400 = vlog2.f32 %v1600_v2  ;;  %v1604_v1 = vadd.f32 1.0, %v1603_v48  ;;  %v1588_v25 = vand.u32 2147483647, %v3076_v6 }
 0x1a6   : > { %2402 = vlog2.f32 %v1582_v29  ;;  %v1595_v19 = vadd.f32 1.0, %v1594_v57  ;;  %v1586_v20 = vadd.f32 1.0, %v1585_v18  ;;  %v1578_v51 = vmul.f32 %v3062_v7, %v1577_v4 }
 0x1a7   : > { %v1632_v24 = vpack.c.bf16 %v3084_v54, %v3082_v60  ;;  %v1605_v35 = vmul.f32 %v3072_v53, %v1604_v1  ;;  %vm1607_vm0 = vcmp.lt.f32.partialorder %v1606_v11, 0.0004427343  ;;  %vm1589_vm1 = vcmp.lt.f32.partialorder %v1588_v25, 0.0004427343 }
 0x1a8   : > { %v2395_v8 = vpop.eup %2394  ;;  %v1596_v23 = vmul.f32 %v3057_v17, %v1595_v19  ;;  %v1587_v7 = vmul.f32 %v3076_v6, %v1586_v20 }
 0x1a9   : > { %v2397_v49 = vpop.eup %2396  ;;  %v1548_v37 = vmul.f32 0.6931472, %v2395_v8 }
 0x1aa   : > { %v1593_v52 = vmul.f32 0.6931472, %v2397_v49 }
 0x1ab   : > { %v1554_v31 = vsel %vm1553_vm13, %v1551_v33, %v1548_v37 }
 0x1ac   : > { %v1618_v28 = vadd.f32 %v1554_v31, %v1394_v46  ;;  %v2399_v9 = vpop.eup %2398  ;;  %v1599_v3 = vsel %vm3101_vm14, %v1596_v23, %v1593_v52 }
 0x1ad   : > { %v1575_v27 = vmul.f32 0.6931472, %v2399_v9  ;;  %v1623_v63 = vadd.f32 %v1599_v3, %v1399_v22 }
 0x1ae   : > { %v1631_v45 = vpack.c.bf16 %v1618_v28, %v1617_v44 }
 0x1af   : > { %v2401_v21 = vpop.eup %2400  ;;  %v1581_v47 = vsel %vm3109_vm15, %v1578_v51, %v1575_v27 }
 0x1b0   : > { %v2403_v26 = vpop.eup %2402  ;;  %v1602_v32 = vmul.f32 0.6931472, %v2401_v21  ;;  %2136 = vmatpush3.bf16.xpose.msra.mxu0 %v1631_v45  ;;  %v1621_v10 = vadd.f32 %v1581_v47, %v1397_v14 }
 0x1b1   : > { %v1584_v43 = vmul.f32 0.6931472, %v2403_v26  ;;  %2137 = vmatprep.subr.bf16.mxu0 %v2470_v38 }
 0x1b2   : > { %v1608_v42 = vsel %vm1607_vm0, %v1605_v35, %v1602_v32 }
 0x1b3   : > { %v1624_v0 = vadd.f32 %v1608_v42, %v1400_v16  ;;  %v1590_v53 = vsel %vm1589_vm1, %v1587_v7, %v1584_v43 }
 0x1b4   : > { %v1622_v59 = vadd.f32 %v1590_v53, %v1398_v39 }
 0x1b5   : > { %v1634_v58 = vpack.c.bf16 %v1624_v0, %v1623_v63 }
 0x1b6   : > { %v1633_v5 = vpack.c.bf16 %v1622_v59, %v1621_v10 }
 0x1b8   : > { %2138 = vmatpush3.bf16.xpose.msra.mxu0 %v1632_v24 }
 0x1b9   : > { %2139 = vmatprep.subr.bf16.mxu0 %v2470_v38 }
 0x1c0   : > { %2140 = vmatpush3.bf16.xpose.msra.mxu0 %v1633_v5  ;;  %v1645_v36 = vpop.permute.xlu0 %1644 }
 0x1c1   : > { %2141 = vmatprep.subr.bf16.mxu0 %v2470_v38 }
 0x1c4   : > { %v1640_v6 = vpop.permute.xlu0 %1639 }
 0x1c8   : > { %2142 = vmatpush3.bf16.xpose.msra.mxu0 %v1634_v58 }
 0x1cf   : > { %2144 = vmatmul.mubr.bf16.vlgmr.msra.gmra.mrb[48].mxu0 %v2339_v55 }
 0x2a2   : > { %v1687_v2 = vpop.f32.mrb[48].mxu0 }
 0x2a3   : > { %v1688_v50 = vadd.f32 %v1687_v2, %v1640_v6  ;;  %v2145_v15 = vpop.f32.mrb[49].mxu0 }
 0x2a4   : > { %v1690_v29 = vpop.f32.mrb[50].mxu0 }
 0x2a5   : > { %1694 = vst [vmem:[%s220_s11] sm:$0xff] %v1688_v50  ;;  %v1691_v60 = vadd.f32 %v1690_v29, %v1645_v36  ;;  %v2146_v38 = vpop.f32.mrb[51].mxu0 }
 0x2a7   : > { %v1695_v54 = vmul.f32 1.442695, %v1691_v60 }
 0x2a9   : > { %2404 = vpow2.f32 %v1695_v54 }
 0x2b3   : > { %v2405_v62 = vpop.eup %2404 }
 0x2b4   : > { %1697 = vst [vmem:[%s220_s11 + $0x8] sm:$0xff] %v2405_v62 }
 0x2b5   : > { %2419 = shalt.err (!%p2416_p3)
}
 0x2b6   : > { %s2420_s26 = scalar_lea.hbm %s3132_s16, 256  ;;  %s2424_s8 = scalar_lea.hbm %s3180_s5, 512 }
 0x2b7   : > { %p2421_p4 = scmp.ne.s32.totalorder %s3132_s16, %s2420_s26  ;;  %p2425_p9 = scmp.lt.u32.totalorder %s3132_s16, %s3180_s5 }
 0x2b8   : > { %p2426_p10 = scmp.lt.u32.totalorder %s2424_s8, %s2420_s26  ;;  %p2428_p12 = scmp.lt.u32.totalorder %s2420_s26, %s3132_s16 }
 0x2b9   : > { %p2422_p7 = pnand %p2421_p4, %p2545_p5 }
 0x2ba   : > { %p2427_p11 = por %p2426_p10, %p2425_p9 }
 0x2bb   : > { %p2423_p8 = pneg %p2422_p7 }
 0x2bc   : > { %p2429_p13 = por %p2428_p12, %p2427_p11 }
 0x2be   : > { %p2430_p0 = pnand %p2429_p13, %p2423_p8 }
 0x2c0   : > { %2433 = shalt.err (!%p2430_p0)
}
 0x2c1   : > { %s2474_s11 = smov 128   ;;  %s2475_s13 = smov 256  }
 0x2c2   : > { %s2476_s14 = smov 8  }
 0x2c3   : > { %2164 = dma.vmem_to_hbm [thread:$0]  (%p2545_p5), %s3127_s7, 256, %s3132_s16, %s3134_s12, %s2474_s11, %s2475_s13, %s2476_s14  }
 0x2c4 PF: > { %p2170_p1 = scmp.ge.s32.totalorder %s2468_s21, 2  ;;  %s1726_s15 = sand.u32 1, %s2456_s18  }
 0x2c5   : > { %s1727_s17 = scalar_lea.sflag [#allocation3], %s1726_s15 }
 0x2c6   : > { %p2167_p2 = pnand %p2170_p1, %p2549_p6 }
 0x2c8   : > { %2451 = dma.done.wait (!%p2167_p2), %s1727_s17, 256  }
 0x2c9   : > { %2453 = vsyncadd (!%p2167_p2), %s1727_s17, 4294967040  ;;  %p15_p3 = scmp.ge.s32.totalorder %s2532_s24, 4   ;;  %s3205_s18 = smov %s2460_s19 }
 0x2ca   : > { %s3206_s19 = smov %s2464_s20  ;;  %s3207_s20 = smov %s2543_s27 }
 0x2cb   : > { %s3208_s21 = smov %s2532_s24  ;;  %17 = sbr.rel (!%p15_p3) target bundleno = 3 (0x3), region = 75 }
 0x2d2   :  { %1732 = vsyncpa [#allocation3], 1 }
 0x2d3   :  { %1734 = vsyncpa [#allocation3 + $0x1], 1 }

</bundles_post_ra>
